<compile_context>
chip_gen: v7x
topology: tpu7x:2x2x1
jax: 0.10.0
libtpu: 0.0.40
codegen_flags: <defaults>
</compile_context>

<pallas_src>
import jax
import jax.numpy as jnp
import numpy as np
from jax.experimental import pallas as pl
from jax.experimental.pallas import tpu as pltpu


# --------------------------------------------------------------------------- #
# Kernel: one batch element per grid step.
#   x_ref   : (1, C, HW) f32  -- channels on sublanes, flattened H*W on lanes
#   w1t_ref : (C, HID)   f32  -- fc1 weight, pre-transposed (PyTorch: (HID, C))
#   w2t_ref : (HID, C)   f32  -- fc2 weight, pre-transposed (PyTorch: (C, HID))
#   out_ref : (1, C, HW) f32
# --------------------------------------------------------------------------- #
def _se_block_kernel(x_ref, w1t_ref, w2t_ref, out_ref):
  f32 = jnp.float32
  x = x_ref[...]                                                # (1, C, HW)

  # squeeze: global average pool over the spatial (lane) axis -> (1, C)
  pooled = jnp.mean(x, axis=-1)

  # excitation: fc1 -> relu -> fc2 -> sigmoid (f32 accumulation)
  h = jnp.dot(pooled, w1t_ref[...], preferred_element_type=f32)  # (1, HID)
  h = jnp.maximum(h, 0.0)
  s = jax.nn.sigmoid(jnp.dot(h, w2t_ref[...], preferred_element_type=f32))  # (1, C)

  # scale: per-channel broadcast along the lane axis; lane-dense store
  out_ref[...] = (x * s[:, :, None]).astype(out_ref.dtype)


# --------------------------------------------------------------------------- #
# Wrapper: NCHW in / NCHW out, no extra HBM passes.
# --------------------------------------------------------------------------- #
def se_block(x_nchw, w1t, w2t):
  B, C, H, W = x_nchw.shape
  HW = H * W
  # Collapse the contiguous (H, W) dims -> free metadata reshape, no HBM pass.
  x = x_nchw.reshape(B, C, HW).astype(jnp.float32)

  # TODO(synk): for production spatial sizes on v7x (32 MiB scoped VMEM), add a
  # grid axis over H*W with an accumulator-carried two-pass pool; at these
  # shapes one (C, H*W) slab per step is tiny so a single spatial block is best.
  out = pl.pallas_call(
      _se_block_kernel,
      out_shape=jax.ShapeDtypeStruct((B, C, HW), jnp.float32),
      grid_spec=pltpu.PrefetchScalarGridSpec(
          num_scalar_prefetch=0,
          grid=(B,),
          in_specs=[
              pl.BlockSpec((1, C, HW), lambda b: (b, 0, 0)),
              pl.BlockSpec(w1t.shape, lambda b: (0, 0)),
              pl.BlockSpec(w2t.shape, lambda b: (0, 0)),
          ],
          out_specs=pl.BlockSpec((1, C, HW), lambda b: (b, 0, 0)),
      ),
      compiler_params=pltpu.CompilerParams(
          dimension_semantics=("parallel",)),   # shard batch across TCs (v7x)
  )(x, w1t, w2t)
  return out.reshape(B, C, H, W)


# --------------------------------------------------------------------------- #
# Deterministic parameter init (shapes follow the PyTorch module __init__;
# nn.Linear weights stored pre-transposed to (in, out) for row-major dots).
# --------------------------------------------------------------------------- #
def init_params(key, in_channels, reduction_ratio=4):
  hid = in_channels // reduction_ratio
  k1, k2 = jax.random.split(key)
  s1 = 1.0 / np.sqrt(in_channels)
  s2 = 1.0 / np.sqrt(hid)
  w1t = jax.random.uniform(k1, (in_channels, hid), jnp.float32, -s1, s1)
  w2t = jax.random.uniform(k2, (hid, in_channels), jnp.float32, -s2, s2)
  return w1t, w2t


# --------------------------------------------------------------------------- #
# Pure-JAX reference (intended SE semantics, see TODO at top).
# --------------------------------------------------------------------------- #
def reference(x_nchw, w1t, w2t):
  hi = jax.lax.Precision.HIGHEST
  pooled = jnp.mean(x_nchw.astype(jnp.float32), axis=(2, 3))          # (B, C)
  h = jax.nn.relu(jnp.dot(pooled, w1t, precision=hi))                 # (B, HID)
  s = jax.nn.sigmoid(jnp.dot(h, w2t, precision=hi))                   # (B, C)
  return x_nchw.astype(jnp.float32) * s[:, :, None, None]


if __name__ == "__main__":
  key = jax.random.PRNGKey(0)
  B, C, H, W = 2, 64, 16, 16          # reduction_ratio=4 -> hidden = 16
  k_x, k_p = jax.random.split(key)
  x = jax.random.normal(k_x, (B, C, H, W), jnp.float32)
  w1t, w2t = init_params(k_p, C)

  out = se_block(x, w1t, w2t)
  out = jax.block_until_ready(out)

  ref = reference(x, w1t, w2t)
  np.testing.assert_allclose(np.asarray(out), np.asarray(ref), rtol=1e-3, atol=1e-3)
  print("KERNEL_OK")
</pallas_src>

<mosaic_0001>
module attributes {stable_mosaic.version = 11 : i64} {
  func.func @_se_block_kernel(%arg0: i32, %arg1: memref<1x64x256xf32, #tpu.memory_space<vmem>>, %arg2: memref<64x16xf32, #tpu.memory_space<vmem>>, %arg3: memref<16x64xf32, #tpu.memory_space<vmem>>, %arg4: memref<1x64x256xf32, #tpu.memory_space<vmem>>) attributes {dimension_semantics = [#tpu.dimension_semantics<parallel>], iteration_bounds = array<i64: 2>, scalar_prefetch = 0 : i64, scratch_operands = 0 : i64, tpu.core_type = #tpu.core_type<tc>, window_params = [{transform_indices = @transform_0, window_bounds = array<i64: 1, 64, 256>}, {pipeline_mode = #tpu.pipeline_mode<synchronous>, transform_indices = @transform_1, window_bounds = array<i64: 64, 16>}, {pipeline_mode = #tpu.pipeline_mode<synchronous>, transform_indices = @transform_2, window_bounds = array<i64: 16, 64>}, {transform_indices = @transform_3, window_bounds = array<i64: 1, 64, 256>}]} {
    %c0 = arith.constant 0 : index
    %c0_0 = arith.constant 0 : index
    %c0_1 = arith.constant 0 : index
    %0 = vector.load %arg1[%c0, %c0_0, %c0_1] : memref<1x64x256xf32, #tpu.memory_space<vmem>>, vector<1x64x256xf32>
    %cst = arith.constant dense<0.000000e+00> : vector<1x64xf32>
    %1 = vector.multi_reduction <add>, %0, %cst [2] : vector<1x64x256xf32> to vector<1x64xf32>
    %cst_2 = arith.constant 2.560000e+02 : f32
    %2 = vector.broadcast %cst_2 : f32 to vector<1x64xf32>
    %3 = arith.divf %1, %2 : vector<1x64xf32>
    %c0_3 = arith.constant 0 : index
    %c0_4 = arith.constant 0 : index
    %4 = vector.load %arg2[%c0_3, %c0_4] : memref<64x16xf32, #tpu.memory_space<vmem>>, vector<64x16xf32>
    %cst_5 = arith.constant dense<0.000000e+00> : vector<1x16xf32>
    %5 = tpu.matmul %3, %4, %cst_5 {dimension_numbers = #tpu.dot_dimension_numbers<[1], [0], [0], [1], [0, 0, 1, 1], [], []>} : vector<1x64xf32>, vector<64x16xf32>, vector<1x16xf32> -> vector<1x16xf32>
    %cst_6 = arith.constant 0.000000e+00 : f32
    %6 = vector.broadcast %cst_6 : f32 to vector<1x16xf32>
    %7 = arith.maximumf %5, %6 : vector<1x16xf32>
    %c0_7 = arith.constant 0 : index
    %c0_8 = arith.constant 0 : index
    %8 = vector.load %arg3[%c0_7, %c0_8] : memref<16x64xf32, #tpu.memory_space<vmem>>, vector<16x64xf32>
    %cst_9 = arith.constant dense<0.000000e+00> : vector<1x64xf32>
    %9 = tpu.matmul %7, %8, %cst_9 {dimension_numbers = #tpu.dot_dimension_numbers<[1], [0], [0], [1], [0, 0, 1, 1], [], []>} : vector<1x16xf32>, vector<16x64xf32>, vector<1x64xf32> -> vector<1x64xf32>
    %10 = arith.negf %9 : vector<1x64xf32>
    %11 = math.exp %10 : vector<1x64xf32>
    %cst_10 = arith.constant 1.000000e+00 : f32
    %12 = vector.broadcast %cst_10 : f32 to vector<1x64xf32>
    %13 = arith.addf %12, %11 : vector<1x64xf32>
    %14 = arith.divf %12, %13 : vector<1x64xf32>
    %15 = vector.shape_cast %14 : vector<1x64xf32> to vector<1x64x1xf32>
    %16 = vector.broadcast %15 : vector<1x64x1xf32> to vector<1x64x256xf32>
    %17 = arith.mulf %0, %16 : vector<1x64x256xf32>
    %c0_11 = arith.constant 0 : index
    %c0_12 = arith.constant 0 : index
    %c0_13 = arith.constant 0 : index
    %18 = vector.load %arg4[%c0_11, %c0_12, %c0_13] : memref<1x64x256xf32, #tpu.memory_space<vmem>>, vector<1x64x256xf32>
    tpu.vector_store %arg4[%c0_11, %c0_12, %c0_13], %17 {strides = array<i32>} : memref<1x64x256xf32, #tpu.memory_space<vmem>>, vector<1x64x256xf32>,
    return
  }
  func.func @transform_0(%arg0: i32) -> (i32, i32, i32) {
    %c0_i32 = arith.constant 0 : i32
    %c0_i32_0 = arith.constant 0 : i32
    %c0_i32_1 = arith.constant 0 : i32
    return %arg0, %c0_i32, %c0_i32_0 : i32, i32, i32
  }
  func.func @transform_1(%arg0: i32) -> (i32, i32) {
    %c0_i32 = arith.constant 0 : i32
    %c0_i32_0 = arith.constant 0 : i32
    %c0_i32_1 = arith.constant 0 : i32
    return %c0_i32, %c0_i32_0 : i32, i32
  }
  func.func @transform_2(%arg0: i32) -> (i32, i32) {
    %c0_i32 = arith.constant 0 : i32
    %c0_i32_0 = arith.constant 0 : i32
    %c0_i32_1 = arith.constant 0 : i32
    return %c0_i32, %c0_i32_0 : i32, i32
  }
  func.func @transform_3(%arg0: i32) -> (i32, i32, i32) {
    %c0_i32 = arith.constant 0 : i32
    %c0_i32_0 = arith.constant 0 : i32
    %c0_i32_1 = arith.constant 0 : i32
    return %arg0, %c0_i32, %c0_i32_0 : i32, i32, i32
  }
}

</mosaic_0001>

<bundles_post_ra>
// kernel: tpu_custom_call.1
= control target key start
LH: loop header
LB: loop body
LE: loop exit
PB: predicated region body
PF: predicated region fallthrough
CT: control target
= control target key end

     0   :  { %8 = vsyncpa [#allocation3], 0  ;;  %s1166_s0 = inlined_call_operand.hbm [shape: f32[2,64,256], index: 0, kind: input, shape index: {}]   ;;  %s1167_s1 = inlined_call_operand.vmem [shape: f32[64,16], index: 1, kind: input, shape index: {}]   ;;  %s1168_s2 = inlined_call_operand.vmem [shape: f32[16,64], index: 2, kind: input, shape index: {}]   ;;  %s1169_s3 = inlined_call_operand.hbm [shape: f32[2,64,256], index: 3, kind: output, shape index: {}]  }
   0x1   :  { %10 = vsyncpa [#allocation3 + $0x1], 0 }
   0x2   :  { %11 = vsyncpa [#allocation4], 0 }
   0x3   :  { %13 = vsyncpa [#allocation4 + $0x1], 0  ;;  %s875_s12 = smov 0   ;;  %s877_s13 = smov 0  }
   0x4   :  { %s879_s14 = smov 0   ;;  %s881_s15 = smov 0  }
   0x5 LB: > { %s896_s16 = sadd.s32 4294967295, %s844_s15   ;;  %s619_s17 = sadd.s32 4294967294, %s844_s15   ;;  %s844_s15 = sphi %s881_s15, %s1182_s15   ;;  %s840_s14 = sphi %s879_s14, %s1181_s14   ;;  %s836_s13 = sphi %s877_s13, %s1180_s13   ;;  %s832_s12 = sphi %s875_s12, %s1179_s12  }
   0x6   : > { %s900_s18 = sadd.s32 1, %s844_s15   ;;  %s26_s19 = sadd.s32 1, %s840_s14 }
   0x7   : > { %s23_s20 = ssub.s32 %s844_s15, %s900_s18  ;;  %p33_p0 = scmp.ne.s32.totalorder %s840_s14, %s836_s13 }
   0x8   : > { %p24_p1 = scmp.eq.s32.totalorder %s23_s20, 0  ;;  %p34_p2 = scmp.eq.s32.totalorder %s844_s15, 0 }
   0x9   : > { %p39_p3 = scmp.ne.s32.totalorder %s836_s13, %s832_s12  ;;  %p40_p4 = scmp.eq.s32.totalorder %s896_s16, 0 }
   0xa   : > { %s912_s21 = scalar_select %p24_p1, %s840_s14, %s26_s19  }
   0xb   : > { %p914_p5 = por %p34_p2, %p33_p0  ;;  %p918_p6 = por %p40_p4, %p39_p3 }
   0xc   : > { %p105_p7 = scmp.eq.s32.totalorder %s896_s16, 1  ;;  %p111_p8 = scmp.eq.s32.totalorder %s619_s17, 1 }
   0xd   : > { %p703_p10 = scmp.lt.s32.totalorder %s844_s15, 2  ;;  %s137_s26 = sand.u32 1, %s840_s14  }
   0xe   : > { %p925_p11 = por %p105_p7, %p33_p0  ;;  %p929_p12 = por %p111_p8, %p39_p3 }
   0xf   : > { %s636_s27 = sshll.u32 %s844_s15, 11  ;;  %s622_s28 = sshll.u32 %s137_s26, 7 }
  0x10   : > { %s1173_s24 = scalar_select %p925_p11, 1, 0 }
  0x11   : > { %s1174_s25 = scalar_select %p929_p12, 1, 0 }
  0x12   : > { %s938_s4 = scalar_lea.hbm %s1166_s0, %s636_s27  ;;  %s141_s5 = scalar_lea.vmem [#allocation2], %s622_s28 }
  0x13   : > { %s148_s6 = sshll.u32 %s141_s5, 4  ;;  %p942_p13 = pnand %p703_p10, %p914_p5  ;;  %s946_s6 = int_to_ptr.vmem [resolvable:$true] %s148_s6 }
  0x14   : > { %s948_s8 = scalar_lea.sflag [#allocation3], %s137_s26  ;;  %s748_s9 = scalar_lea.hbm %s938_s4, 2048 }
  0x15   : > { %p749_p0 = scmp.ne.s32.totalorder %s938_s4, %s748_s9  ;;  %p750_p1 = pneg %p942_p13 }
  0x16   : > { %s753_s17 = scalar_lea.hbm %s1166_s0, 4096  ;;  %p754_p4 = scmp.lt.u32.totalorder %s938_s4, %s1166_s0 }
  0x17   : > { %p751_p2 = pnand %p750_p1, %p749_p0  ;;  %p755_p5 = scmp.lt.u32.totalorder %s753_s17, %s748_s9 }
  0x18   : > { %p757_p8 = scmp.lt.u32.totalorder %s748_s9, %s938_s4 }
  0x19   : > { %p752_p3 = pneg %p751_p2  ;;  %p756_p7 = por %p755_p5, %p754_p4 }
  0x1b   : > { %p758_p10 = por %p757_p8, %p756_p7 }
  0x1d   : > { %p759_p9 = pnand %p758_p10, %p752_p3 }
  0x1f   : > { %762 = shalt.err (!%p759_p9)
}
  0x20   : > { %s763_s22 = scalar_lea.vmem %s946_s6, 2048  ;;  %s846_s26 = smov [#allocation2]  }
  0x21   : > { %p764_p0 = scmp.ne.s32.totalorder %s946_s6, %s763_s22  ;;  %s768_s27 = sshll.u32 %s846_s26, 4  ;;  %s769_s27 = int_to_ptr.vmem [resolvable:$false] %s768_s27 }
  0x22   : > { %s770_s28 = scalar_lea.vmem %s769_s27, 4096  ;;  %p771_p11 = scmp.lt.s32.totalorder %s946_s6, %s769_s27 }
  0x23   : > { %p766_p2 = pnand %p764_p0, %p750_p1  ;;  %p772_p4 = scmp.lt.s32.totalorder %s770_s28, %s763_s22 }
  0x25   : > { %p767_p12 = pneg %p766_p2  ;;  %p773_p5 = por %p772_p4, %p771_p11 }
  0x27   : > { %p774_p7 = pnand %p773_p5, %p767_p12 }
  0x29   : > { %777 = shalt.err (!%p774_p7)
}
  0x2a   : > { %s847_s29 = smov 256   ;;  %s848_s30 = smov 16  }
  0x2b   : > { %698 = dma.hbm_to_vmem [thread:$0]  (!%p942_p13), %s938_s4, 2048, %s946_s6, %s948_s8, %s847_s29, %s847_s29, %s848_s30  }
  0x2c   : > { %p625_p9 = scmp.ge.s32.totalorder %s844_s15, 1  ;;  %p156_p1 = scmp.lt.s32.totalorder %s844_s15, 3 }
  0x2e   : > { %p157_p3 = pnand %p625_p9, %p156_p1 }
  0x2f   : > { %s979_s5 = sand.u32 (!%p157_p3), 1, %s836_s13  }
  0x30   : > { %160 = sbr.rel (%p157_p3) target bundleno = 821 (0x335), region = 32  ;;  %s626_s9 = sshll.u32 (!%p157_p3), %s979_s5, 7 }
  0x31   : > { %s163_s10 = scalar_lea.sflag (!%p157_p3), [#allocation3], %s979_s5  ;;  %s166_s11 = scalar_lea.vmem (!%p157_p3), [#allocation2], %s626_s9 }
  0x37   : > { %823 = dma.done.wait (%p918_p6), %s163_s10, 2048  }
  0x38   : > { %825 = vsyncadd (%p918_p6), %s163_s10, 4294965248  ;;  %v989_v0 = vld [vmem:[%s166_s11] sm:$0xff]  ;;  %v991_v1 = vld [vmem:[%s166_s11 + $0x8] sm:$0xff]  ;;  %v849_v27 = vmov 0.0|0.0   ;;  %vm850_vm0 = vmmov 0   ;;  %v851_v37 = vmov 0.0   ;;  %v254_v38 = vlaneseq }
  0x39   : > { %v993_v2 = vld [vmem:[%s166_s11 + $0x20] sm:$0xff]  ;;  %v205_v3 = vadd.f32 %v991_v1, %v989_v0  ;;  %v997_v4 = vld [vmem:[%s166_s11 + $0x28] sm:$0xff]  ;;  %v999_v5 = vld [vmem:[%s166_s11 + $0x10] sm:$0xff]  ;;  %676 = vmatprep.subr.bf16.mxu0 %v849_v27  ;;  %688 = vmatprep.subr.bf16.mxu1 %v849_v27  ;;  %vm265_vm1 = vcmask 130112   ;;  %vm272_vm2 = vcmask 195712   ;;  %vm279_vm3 = vcmask 261312  }
  0x3a   : > { %v1001_v6 = vld [vmem:[%s166_s11 + $0x18] sm:$0xff]  ;;  %v211_v7 = vadd.f32 %v997_v4, %v993_v2  ;;  %v1005_v8 = vld [vmem:[%s166_s11 + $0x30] sm:$0xff]  ;;  %v1013_v12 = vld [vmem:[%s166_s11 + $0x40] sm:$0xff]  ;;  %666 = vmatprep.mubr.msk.f32.mxu0 %vm850_vm0, %v851_v37  ;;  %673 = vmatprep.mubr.msk.f32.mxu1 %vm850_vm0, %v851_v37  ;;  %v255_v39 = vand.u32 127, %v254_v38  ;;  %v1061_v40 = vshrl.u32 %v254_v38, 7  ;;  %vm286_vm4 = vcmask 326912  }
  0x3b   : > { %v1007_v9 = vld [vmem:[%s166_s11 + $0x38] sm:$0xff]  ;;  %206 = vadd.xlane.f32.xlu0 %v205_v3  ;;  %v208_v10 = vadd.f32 %v1001_v6, %v999_v5  ;;  %v1015_v13 = vld [vmem:[%s166_s11 + $0x48] sm:$0xff]  ;;  %v1017_v14 = vld [vmem:[%s166_s11 + $0x50] sm:$0xff]  ;;  %vm293_vm5 = vcmask 392512   ;;  %vm300_vm6 = vcmask 458112   ;;  %vm307_vm7 = vcmask 523712  }
  0x3c   : > { %212 = vadd.xlane.f32.xlu1 %v211_v7  ;;  %v214_v11 = vadd.f32 %v1007_v9, %v1005_v8  ;;  %v1019_v15 = vld [vmem:[%s166_s11 + $0x58] sm:$0xff]  ;;  %v217_v16 = vadd.f32 %v1015_v13, %v1013_v12  ;;  %v1025_v18 = vld [vmem:[%s166_s11 + $0x60] sm:$0xff]  ;;  %v1027_v19 = vld [vmem:[%s166_s11 + $0x68] sm:$0xff]  ;;  %v260_v41 = vadd.s32 4294967288, %v255_v39  ;;  %v267_v43 = vadd.s32 4294967280, %v255_v39  ;;  %s1085_s8 = scalar_lea.vmem [#allocation5], %s626_s9 }
  0x3d   : > { %v220_v17 = vadd.f32 %v1019_v15, %v1017_v14  ;;  %v1029_v20 = vld [vmem:[%s166_s11 + $0x70] sm:$0xff]  ;;  %v1031_v21 = vld [vmem:[%s166_s11 + $0x78] sm:$0xff]  ;;  %v223_v22 = vadd.f32 %v1027_v19, %v1025_v18  ;;  %v238_v24 = vld [vmem:[%s1167_s1] sm:$0xff]  ;;  %v274_v44 = vadd.s32 4294967272, %v255_v39  ;;  %v258_v46 = vsub.s32 %v255_v39, %v1061_v40  ;;  %s637_s9 = sshll.u32 %s896_s16, 11  ;;  %s546_s17 = sshll.u32 %s1085_s8, 4  ;;  %s1118_s17 = int_to_ptr.vmem [resolvable:$true] %s546_s17 }
  0x3e   : > { %v226_v23 = vadd.f32 %v1031_v21, %v1029_v20  ;;  %v239_v25 = vld [vmem:[%s1167_s1 + $0x8] sm:$0xff]  ;;  %v240_v28 = vld [vmem:[%s1167_s1 + $0x10] sm:$0xff]  ;;  %v241_v29 = vld [vmem:[%s1167_s1 + $0x18] sm:$0xff]  ;;  %v263_v48 = vsub.s32 %v260_v41, %v1061_v40  ;;  %v281_v49 = vadd.s32 4294967264, %v255_v39  ;;  %v270_v50 = vsub.s32 %v267_v43, %v1061_v40  ;;  %s1116_s22 = scalar_lea.hbm %s1169_s3, %s637_s9  ;;  %s533_s16 = scalar_lea.sflag [#allocation4], %s979_s5 }
  0x3f   : > { %209 = vadd.xlane.f32.xlu0 %v208_v10  ;;  %v677_v26 = vpack.c.bf16 %v239_v25, %v238_v24  ;;  %v680_v30 = vpack.c.bf16 %v241_v29, %v240_v28  ;;  %v242_v31 = vld [vmem:[%s1167_s1 + $0x20] sm:$0xff]  ;;  %v243_v32 = vld [vmem:[%s1167_s1 + $0x28] sm:$0xff]  ;;  %v244_v34 = vld [vmem:[%s1167_s1 + $0x30] sm:$0xff]  ;;  %v277_v53 = vsub.s32 %v274_v44, %v1061_v40  ;;  %v288_v54 = vadd.s32 4294967256, %v255_v39  ;;  %s778_s26 = scalar_lea.vmem %s1118_s17, 2048  ;;  %p1176_p11 = scmp.ne.s32.totalorder %s1173_s24, 0 }
  0x40   : > { %215 = vadd.xlane.f32.xlu1 %v214_v11  ;;  %v683_v33 = vpack.c.bf16 %v243_v32, %v242_v31  ;;  %v245_v35 = vld [vmem:[%s1167_s1 + $0x38] sm:$0xff]  ;;  %v284_v60 = vsub.s32 %v281_v49, %v1061_v40  ;;  %v295_v61 = vadd.s32 4294967248, %v255_v39  ;;  %v302_v10 = vadd.s32 4294967240, %v255_v39  ;;  %v383_v39 = vld [vmem:[%s1168_s2] sm:$0xff]  ;;  %v384_v41 = vld [vmem:[%s1168_s2 + $0x8] sm:$0xff]  ;;  %p779_p6 = scmp.ne.s32.totalorder %s1118_s17, %s778_s26  ;;  %s852_s27 = smov [#allocation5]  }
  0x41   : > { %678 = vmatpush3.bf16.msra.mxu0 %v677_v26  ;;  %v686_v36 = vpack.c.bf16 %v245_v35, %v244_v34  ;;  %v291_v7 = vsub.s32 %v288_v54, %v1061_v40  ;;  %vm309_vm8 = vcmask 523264   ;;  %vm385_vm9 = vcmask 130048   ;;  %s782_s28 = sshll.u32 %s852_s27, 4  ;;  %s783_s28 = int_to_ptr.vmem [resolvable:$false] %s782_s28 }
  0x42   : > { %679 = vmatprep.subr.bf16.mxu0 %v849_v27  ;;  %v298_v26 = vsub.s32 %v295_v61, %v1061_v40  ;;  %v305_v29 = vsub.s32 %v302_v10, %v1061_v40  ;;  %p780_p12 = pnand %p779_p6, %p1176_p11  ;;  %s784_s29 = scalar_lea.vmem %s783_s28, 4096 }
  0x43   : > { %218 = vadd.xlane.f32.xlu0 %v217_v16  ;;  %p785_p8 = scmp.lt.s32.totalorder %s1118_s17, %s783_s28  ;;  %p786_p10 = scmp.lt.s32.totalorder %s784_s29, %s778_s26 }
  0x44   : > { %221 = vadd.xlane.f32.xlu1 %v220_v17  ;;  %p781_p13 = pneg %p780_p12 }
  0x45   : > { %681 = vmatpush3.bf16.msra.mxu0 %v680_v30  ;;  %p787_p0 = por %p786_p10, %p785_p8 }
  0x46   : > { %682 = vmatprep.subr.bf16.mxu0 %v849_v27 }
  0x47   : > { %224 = vadd.xlane.f32.xlu0 %v223_v22  ;;  %p788_p2 = pnand %p787_p0, %p781_p13 }
  0x48   : > { %227 = vadd.xlane.f32.xlu1 %v226_v23 }
  0x49   : > { %684 = vmatpush3.bf16.msra.mxu0 %v683_v33 }
  0x4a   : > { %685 = vmatprep.subr.bf16.mxu0 %v849_v27 }
  0x4d   : > { %687 = vmatpush3.bf16.msra.mxu0 %v686_v36 }
  0xc8   : > { %v207_v42 = vpop.xlane.xlu0 %206 }
  0xc9   : > { %v213_v45 = vpop.xlane.xlu1 %212  ;;  %v230_v47 = vmul.f32 0.00390625, %v207_v42  ;;  %v689_v42 = vpack.c.bf16 %v384_v41, %v383_v39 }
  0xca   : > { %v232_v51 = vmul.f32 0.00390625, %v213_v45 }
  0xcb   : > { %v259_v58 = vrot.slane %v230_v47, %v258_v46  ;;  %690 = vmatpush3.bf16.msra.mxu1 %v689_v42 }
  0xcc   : > { %v210_v52 = vpop.xlane.xlu0 %209  ;;  %v271_v62 = vrot.slane %v232_v51, %v270_v50  ;;  %v467_v51 = vsub.s32 0, %v1061_v40 }
  0xcd   : > { %v231_v55 = vmul.f32 0.00390625, %v210_v52  ;;  %v216_v56 = vpop.xlane.xlu1 %215 }
  0xce   : > { %v233_v57 = vmul.f32 0.00390625, %v216_v56 }
  0xcf   : > { %v264_v59 = vrot.slane %v231_v55, %v263_v48 }
  0xd0   : > { %v278_v63 = vrot.slane %v233_v57, %v277_v53  ;;  %v219_v3 = vpop.xlane.xlu0 %218 }
  0xd1   : > { %v266_v11 = vsel %vm265_vm1, %v264_v59, %v259_v58  ;;  %v234_v16 = vmul.f32 0.00390625, %v219_v3  ;;  %v222_v17 = vpop.xlane.xlu1 %221 }
  0xd2   : > { %v273_v22 = vsel %vm272_vm2, %v271_v62, %v266_v11  ;;  %v235_v23 = vmul.f32 0.00390625, %v222_v17 }
  0xd3   : > { %v280_v24 = vsel %vm279_vm3, %v278_v63, %v273_v22  ;;  %v285_v25 = vrot.slane %v234_v16, %v284_v60 }
  0xd4   : > { %v292_v27 = vrot.slane %v235_v23, %v291_v7  ;;  %v225_v28 = vpop.xlane.xlu0 %224 }
  0xd5   : > { %v287_v30 = vsel %vm286_vm4, %v285_v25, %v280_v24  ;;  %v236_v31 = vmul.f32 0.00390625, %v225_v28  ;;  %v228_v32 = vpop.xlane.xlu1 %227 }
  0xd6   : > { %v237_v33 = vmul.f32 0.00390625, %v228_v32  ;;  %v294_v35 = vsel %vm293_vm5, %v292_v27, %v287_v30 }
  0xd7   : > { %v299_v34 = vrot.slane %v236_v31, %v298_v26 }
  0xd8   : > { %v306_v36 = vrot.slane %v237_v33, %v305_v29 }
  0xd9   : > { %v301_v37 = vsel %vm300_vm6, %v299_v34, %v294_v35 }
  0xda   : > { %v308_v38 = vsel %vm307_vm7, %v306_v36, %v301_v37 }
  0xdb   : > { %667 = vmatmul.mubr.msk.f32.vlgmr.msra.gmra.mrb[0].mxu0 %vm309_vm8, %v308_v38 }
 0x1ae   : > { %v378_v43 = vpop.f32.mrb[0].mxu0 }
 0x1af   : > { %v382_v44 = vmax.f32 %v378_v43, 0.0  ;;  %v668_v45 = vpop.f32.mrb[1].mxu0 }
 0x1b1   : > { %674 = vmatmul.mubr.msk.f32.vlgmr.msra.gmra.mrb[0].mxu1 %vm385_vm9, %v382_v44 }
 0x284   : > { %v455_v46 = vpop.f32.mrb[0].mxu1 }
 0x285   : > { %v630_v47 = vmul.f32 -1.442695, %v455_v46  ;;  %v675_v48 = vpop.f32.mrb[1].mxu1 }
 0x287   : > { %744 = vpow2.f32 %v630_v47 }
 0x291   : > { %v745_v49 = vpop.eup %744 }
 0x292   : > { %v462_v50 = vadd.f32 1.0, %v745_v49 }
 0x294   : > { %746 = vrcp.f32 %v462_v50 }
 0x29e   : > { %v747_v52 = vpop.eup %746 }
 0x29f   : > { %v468_v53 = vrot.slane %v747_v52, %v467_v51 }
 0x2a1   : > { %474 = vbcast.lane.b32.xlu1 %v468_v53, 264  ;;  %470 = vbcast.lane.b32.xlu0 %v468_v53, 256 }
 0x2a5   : > { %478 = vbcast.lane.b32.xlu1 %v468_v53, 272  ;;  %486 = vbcast.lane.b32.xlu0 %v468_v53, 288 }
 0x2a9   : > { %482 = vbcast.lane.b32.xlu1 %v468_v53, 280  ;;  %494 = vbcast.lane.b32.xlu0 %v468_v53, 304 }
 0x2ad   : > { %490 = vbcast.lane.b32.xlu1 %v468_v53, 296 }
 0x2b1   : > { %498 = vbcast.lane.b32.xlu1 %v468_v53, 312 }
 0x313   : > { %v475_v54 = vpop.permute.xlu1 %474  ;;  %v471_v55 = vpop.permute.xlu0 %470 }
 0x314   : > { %v502_v56 = vmul.f32 %v475_v54, %v999_v5  ;;  %v503_v57 = vmul.f32 %v475_v54, %v1001_v6  ;;  %v500_v58 = vmul.f32 %v471_v55, %v989_v0  ;;  %v501_v40 = vmul.f32 %v471_v55, %v991_v1 }
 0x316   : > { %518 = vst [vmem:[%s1085_s8 + $0x10] sm:$0xff] %v502_v56  ;;  %519 = vst [vmem:[%s1085_s8 + $0x18] sm:$0xff] %v503_v57 }
 0x317   : > { %516 = vst [vmem:[%s1085_s8] sm:$0xff] %v500_v58  ;;  %517 = vst [vmem:[%s1085_s8 + $0x8] sm:$0xff] %v501_v40  ;;  %v479_v5 = vpop.permute.xlu1 %478  ;;  %v487_v0 = vpop.permute.xlu0 %486 }
 0x318   : > { %v504_v1 = vmul.f32 %v479_v5, %v993_v2  ;;  %v505_v6 = vmul.f32 %v479_v5, %v997_v4  ;;  %v508_v59 = vmul.f32 %v487_v0, %v1013_v12  ;;  %v509_v60 = vmul.f32 %v487_v0, %v1015_v13 }
 0x31a   : > { %520 = vst [vmem:[%s1085_s8 + $0x20] sm:$0xff] %v504_v1  ;;  %521 = vst [vmem:[%s1085_s8 + $0x28] sm:$0xff] %v505_v6 }
 0x31b   : > { %524 = vst [vmem:[%s1085_s8 + $0x40] sm:$0xff] %v508_v59  ;;  %525 = vst [vmem:[%s1085_s8 + $0x48] sm:$0xff] %v509_v60  ;;  %v483_v61 = vpop.permute.xlu1 %482  ;;  %v495_v62 = vpop.permute.xlu0 %494 }
 0x31c   : > { %v506_v2 = vmul.f32 %v483_v61, %v1005_v8  ;;  %v507_v63 = vmul.f32 %v483_v61, %v1007_v9  ;;  %v512_v4 = vmul.f32 %v495_v62, %v1025_v18  ;;  %v513_v12 = vmul.f32 %v495_v62, %v1027_v19 }
 0x31e   : > { %522 = vst [vmem:[%s1085_s8 + $0x30] sm:$0xff] %v506_v2  ;;  %523 = vst [vmem:[%s1085_s8 + $0x38] sm:$0xff] %v507_v63 }
 0x31f   : > { %528 = vst [vmem:[%s1085_s8 + $0x60] sm:$0xff] %v512_v4  ;;  %529 = vst [vmem:[%s1085_s8 + $0x68] sm:$0xff] %v513_v12  ;;  %v491_v13 = vpop.permute.xlu1 %490 }
 0x320   : > { %v510_v3 = vmul.f32 %v491_v13, %v1017_v14  ;;  %v511_v7 = vmul.f32 %v491_v13, %v1019_v15 }
 0x322   : > { %526 = vst [vmem:[%s1085_s8 + $0x50] sm:$0xff] %v510_v3  ;;  %527 = vst [vmem:[%s1085_s8 + $0x58] sm:$0xff] %v511_v7 }
 0x323   : > { %v499_v8 = vpop.permute.xlu1 %498 }
 0x324   : > { %v514_v9 = vmul.f32 %v499_v8, %v1029_v20  ;;  %v515_v14 = vmul.f32 %v499_v8, %v1031_v21 }
 0x326   : > { %530 = vst [vmem:[%s1085_s8 + $0x70] sm:$0xff] %v514_v9  ;;  %531 = vst [vmem:[%s1085_s8 + $0x78] sm:$0xff] %v515_v14 }
 0x327   : > { %791 = shalt.err (!%p788_p2)
}
 0x328   : > { %s792_s30 = scalar_lea.hbm %s1116_s22, 2048  ;;  %s796_s23 = scalar_lea.hbm %s1169_s3, 4096 }
 0x329   : > { %p793_p4 = scmp.ne.s32.totalorder %s1116_s22, %s792_s30  ;;  %p797_p9 = scmp.lt.u32.totalorder %s1116_s22, %s1169_s3 }
 0x32a   : > { %p798_p1 = scmp.lt.u32.totalorder %s796_s23, %s792_s30  ;;  %p800_p6 = scmp.lt.u32.totalorder %s792_s30, %s1116_s22 }
 0x32b   : > { %p794_p5 = pnand %p793_p4, %p1176_p11 }
 0x32c   : > { %p799_p3 = por %p798_p1, %p797_p9 }
 0x32d   : > { %p795_p7 = pneg %p794_p5 }
 0x32e   : > { %p801_p12 = por %p800_p6, %p799_p3 }
 0x330   : > { %p802_p13 = pnand %p801_p12, %p795_p7 }
 0x332   : > { %805 = shalt.err (!%p802_p13)
}
 0x333   : > { %s853_s7 = smov 256   ;;  %s854_s8 = smov 16  }
 0x334   : > { %693 = dma.vmem_to_hbm [thread:$0]  (%p1176_p11), %s1118_s17, 2048, %s1116_s22, %s533_s16, %s853_s7, %s853_s7, %s854_s8  }
 0x335 PF: > { %s561_s9 = sand.u32 1, %s832_s12   ;;  %p1177_p8 = scmp.ne.s32.totalorder %s1174_s25, 0 }
 0x336   : > { %p1178_p10 = scmp.ge.s32.totalorder %s844_s15, 2  ;;  %s562_s19 = scalar_lea.sflag [#allocation4], %s561_s9 }
 0x338   : > { %p700_p0 = pnand %p1178_p10, %p1177_p8 }
 0x33a   : > { %827 = dma.done.wait (!%p700_p0), %s562_s19, 2048  }
 0x33b   : > { %829 = vsyncadd (!%p700_p0), %s562_s19, 4294965248  ;;  %p16_p2 = scmp.ge.s32.totalorder %s900_s18, 4   ;;  %s1179_s12 = smov %s836_s13 }
 0x33c   : > { %s1180_s13 = smov %s840_s14  ;;  %s1181_s14 = smov %s912_s21 }
 0x33d   : > { %s1182_s15 = smov %s900_s18  ;;  %18 = sbr.rel (!%p16_p2) target bundleno = 5 (0x5), region = 77 }
 0x344   :  { %567 = vsyncpa [#allocation3], 1 }
 0x345   :  { %569 = vsyncpa [#allocation3 + $0x1], 1 }
 0x346   :  { %570 = vsyncpa [#allocation4], 1 }
 0x347   :  { %572 = vsyncpa [#allocation4 + $0x1], 1 }

</bundles_post_ra>
